<compile_context>
chip_gen: v7x
topology: tpu7x:2x2x1
jax: 0.10.0
libtpu: 0.0.40
codegen_flags: <defaults>
</compile_context>

<pallas_src>
import functools

import jax
import jax.numpy as jnp
from jax.experimental import pallas as pl
from jax.experimental.pallas import tpu as pltpu


# ----------------------------- Pallas kernel --------------------------------
def _mlp_kernel(num_fc, compute_dtype,
                uidx_ref, iidx_ref, eu_ref, ei_ref, *refs):
    """Fused forward for one batch tile.

    refs = (w0_user, w0_item, b0, w1, b1, ..., w_{L-1}, b_{L-1}, w_aff, b_aff, out_ref)

    All activations are carried as (features, batch_tile) so batch maps to lanes.
    The embedding lookup is an exact one-hot(indices) @ table matmul (MXU), which
    also removes the user/item concat by splitting the first fc weight.
    """
    out_ref = refs[-1]
    prefs = refs[:-1]

    bt = out_ref.shape[-1]
    nu = eu_ref.shape[-1]
    ni = ei_ref.shape[-1]

    # ---- fused embedding lookup: one-hot gather via MXU (batch on lanes) ----
    u_idx = uidx_ref[...]                                          # (1, bt) int32
    i_idx = iidx_ref[...]                                          # (1, bt) int32
    oh_u = (jax.lax.broadcasted_iota(jnp.int32, (nu, bt), 0) == u_idx
            ).astype(compute_dtype)                                # (nu, bt)
    oh_i = (jax.lax.broadcasted_iota(jnp.int32, (ni, bt), 0) == i_idx
            ).astype(compute_dtype)                                # (ni, bt)
    u_emb = jnp.dot(eu_ref[...].astype(compute_dtype), oh_u,
                    preferred_element_type=jnp.float32)            # (d, bt)
    i_emb = jnp.dot(ei_ref[...].astype(compute_dtype), oh_i,
                    preferred_element_type=jnp.float32)            # (d, bt)

    # ---- layer 0: split weight => no concat:  W0 @ [u; i] = W0u@u + W0i@i ----
    w0u = prefs[0][...].astype(compute_dtype)                      # (h0, d)
    w0i = prefs[1][...].astype(compute_dtype)                      # (h0, d)
    b0 = prefs[2][...]                                             # (h0, 1) f32
    v = (jnp.dot(w0u, u_emb.astype(compute_dtype), preferred_element_type=jnp.float32)
         + jnp.dot(w0i, i_emb.astype(compute_dtype), preferred_element_type=jnp.float32)
         + b0)
    v = jnp.maximum(v, 0.0)                                        # ReLU (f32 VPU)

    # ---- remaining fc layers: v = relu(W @ v + b), f32 accumulation ----
    for l in range(1, num_fc):
        w = prefs[3 + 2 * (l - 1)][...].astype(compute_dtype)
        b = prefs[4 + 2 * (l - 1)][...]
        v = jnp.dot(w, v.astype(compute_dtype),
                    preferred_element_type=jnp.float32) + b
        v = jnp.maximum(v, 0.0)

    # ---- final 1-output affine on VPU + sublane reduce (skip an N=1 MXU pass) ----
    w_aff = prefs[-2][...]                                         # (h_last, 1) f32
    b_aff = prefs[-1][...]                                         # (1, 1) f32
    logits = jnp.sum(w_aff * v, axis=0, keepdims=True) + b_aff     # (1, bt)
    out_ref[...] = jax.nn.sigmoid(logits).astype(out_ref.dtype)    # EUP, lane-dense store


# ------------------------------- Wrapper -------------------------------------
def mlp_forward_pallas(params, user_indices, item_indices, *,
                       compute_dtype=jnp.float32):
    """Full NCF-MLP forward in one pallas_call.

    `compute_dtype=jnp.bfloat16` can be used for large-batch serving on
    v5e/v6e/v7x (matmul inputs in bf16, f32 accumulation, f32 elementwise);
    the default f32 keeps bit-for-bit parity with the f32 reference.
    """
    emb_user = params["emb_user"]          # (NU, d)
    emb_item = params["emb_item"]          # (NI, d)
    fc_ws = params["fc_weights"]           # list of (out, in)   (PyTorch layout)
    fc_bs = params["fc_biases"]            # list of (out,)
    aff_w = params["aff_w"]                # (1, in_last)
    aff_b = params["aff_b"]                # (1,)

    batch = int(user_indices.shape[0])
    d = int(emb_user.shape[1])
    num_fc = len(fc_ws)

    # --- layout adaptation (cheap glue; constant-folded/fused by XLA) ---
    eu_t = emb_user.T                                      # (d, NU)
    ei_t = emb_item.T                                      # (d, NI)
    w0 = fc_ws[0]
    kernel_params = [w0[:, :d], w0[:, d:], fc_bs[0].reshape(-1, 1)]
    for w, b in zip(fc_ws[1:], fc_bs[1:]):
        kernel_params.append(w)
        kernel_params.append(b.reshape(-1, 1))
    kernel_params.append(aff_w.reshape(-1, 1))             # (in_last, 1)
    kernel_params.append(aff_b.reshape(1, 1))              # (1, 1)

    uidx = user_indices.astype(jnp.int32).reshape(1, batch)
    iidx = item_indices.astype(jnp.int32).reshape(1, batch)

    # --- batch tile: lane-dense multiple of 128 when possible (tiny VMEM
    #     footprint, safe on v7x's 64 MiB as well as v5e/v6e); otherwise one
    #     full-batch tile so the (8,128) rule is satisfied via full extents. ---
    bt = batch
    for cand in (512, 256, 128):
        if batch % cand == 0:
            bt = cand
            break
    grid = (batch // bt,)

    batch_spec = pl.BlockSpec((1, bt), lambda b: (0, b))

    def const_spec(arr):  # full-array block, VMEM-resident across the grid
        return pl.BlockSpec(arr.shape, lambda b: (0, 0))

    in_specs = [batch_spec, batch_spec, const_spec(eu_t), const_spec(ei_t)]
    in_specs += [const_spec(p) for p in kernel_params]

    # Advisory cost estimate so XLA schedules neighbors sensibly around this call.
    flops_per_row = 2 * (eu_t.size + ei_t.size)            # one-hot gather matmuls
    flops_per_row += 2 * sum(int(w.size) for w in fc_ws)   # fc layers
    flops_per_row += 2 * int(aff_w.size)                   # final affine
    all_inputs = [uidx, iidx, eu_t, ei_t] + kernel_params
    bytes_accessed = int(sum(int(a.size) * a.dtype.itemsize for a in all_inputs)
                         + batch * 4)
    cost = pl.CostEstimate(flops=int(batch * flops_per_row),
                           transcendentals=int(batch),
                           bytes_accessed=bytes_accessed)

    out = pl.pallas_call(
        functools.partial(_mlp_kernel, num_fc, compute_dtype),
        out_shape=jax.ShapeDtypeStruct((1, batch), jnp.float32),
        grid=grid,
        in_specs=in_specs,
        out_specs=pl.BlockSpec((1, bt), lambda b: (0, b)),
        compiler_params=pltpu.CompilerParams(
            dimension_semantics=("parallel",)),
        cost_estimate=cost,
    )(uidx, iidx, eu_t, ei_t, *kernel_params)

    return out.reshape(batch, 1)                            # match PyTorch (B, 1)


# ------------------------------ Module glue ---------------------------------
def init_mlp_params(key, config):
    """Deterministic parameter init mirroring the PyTorch module's shapes
    (embeddings (N, d); Linear weights (out, in); biases (out,))."""
    num_users = config["num_users"]
    num_items = config["num_items"]
    latent_dim = config["latent_dim"]
    layers = config["layers"]

    keys = jax.random.split(key, 2 + 2 * (len(layers) - 1) + 2)
    k_iter = iter(keys)

    emb_user = jax.random.normal(next(k_iter), (num_users, latent_dim), jnp.float32) * 0.1
    emb_item = jax.random.normal(next(k_iter), (num_items, latent_dim), jnp.float32) * 0.1

    fc_weights, fc_biases = [], []
    for in_size, out_size in zip(layers[:-1], layers[1:]):
        w = jax.random.normal(next(k_iter), (out_size, in_size), jnp.float32) * (1.0 / jnp.sqrt(in_size))
        b = jax.random.normal(next(k_iter), (out_size,), jnp.float32) * 0.01
        fc_weights.append(w)
        fc_biases.append(b)

    aff_w = jax.random.normal(next(k_iter), (1, layers[-1]), jnp.float32) * (1.0 / jnp.sqrt(layers[-1]))
    aff_b = jax.random.normal(next(k_iter), (1,), jnp.float32) * 0.01

    return dict(emb_user=emb_user, emb_item=emb_item,
                fc_weights=fc_weights, fc_biases=fc_biases,
                aff_w=aff_w, aff_b=aff_b)


def mlp_forward(params, user_indices, item_indices):
    # Entire forward (gather + MLP + sigmoid) is fused into one Pallas kernel.
    return mlp_forward_pallas(params, user_indices, item_indices)


def mlp_forward_ref(params, user_indices, item_indices):
    """Pure-JAX reference mirroring the PyTorch module exactly."""
    u = jnp.take(params["emb_user"], user_indices, axis=0)
    i = jnp.take(params["emb_item"], item_indices, axis=0)
    v = jnp.concatenate([u, i], axis=-1)
    for w, b in zip(params["fc_weights"], params["fc_biases"]):
        v = jnp.maximum(v @ w.T + b, 0.0)
    logits = v @ params["aff_w"].T + params["aff_b"]
    return jax.nn.sigmoid(logits)


# TODO(synk): load_pretrain_weights / GMF checkpoint loading is host-side I/O
# (torch checkpoint resume) with no Pallas-kernel equivalent; omitted.


# --------------------------------- Main --------------------------------------
if __name__ == "__main__":
    config = {
        "num_users": 32,
        "num_items": 48,
        "latent_dim": 8,
        "layers": [16, 32, 16, 8],  # layers[0] == 2 * latent_dim
    }
    batch = 8

    key = jax.random.PRNGKey(0)
    k_params, k_u, k_i = jax.random.split(key, 3)
    params = init_mlp_params(k_params, config)

    user_indices = jax.random.randint(k_u, (batch,), 0, config["num_users"], dtype=jnp.int32)
    item_indices = jax.random.randint(k_i, (batch,), 0, config["num_items"], dtype=jnp.int32)

    rating = mlp_forward(params, user_indices, item_indices)
    rating = jax.block_until_ready(rating)

    ref = jax.block_until_ready(mlp_forward_ref(params, user_indices, item_indices))
    assert rating.shape == (batch, 1)
    assert jnp.allclose(rating, ref, atol=1e-5, rtol=1e-5)

    print("KERNEL_OK")
</pallas_src>

<mosaic_0001>
module attributes {stable_mosaic.version = 11 : i64} {
  func.func @_mlp_kernel(%arg0: i32, %arg1: memref<1x8xi32, #tpu.memory_space<vmem>>, %arg2: memref<1x8xi32, #tpu.memory_space<vmem>>, %arg3: memref<8x32xf32, #tpu.memory_space<vmem>>, %arg4: memref<8x48xf32, #tpu.memory_space<vmem>>, %arg5: memref<32x8xf32, #tpu.memory_space<vmem>>, %arg6: memref<32x8xf32, #tpu.memory_space<vmem>>, %arg7: memref<32x1xf32, #tpu.memory_space<vmem>>, %arg8: memref<16x32xf32, #tpu.memory_space<vmem>>, %arg9: memref<16x1xf32, #tpu.memory_space<vmem>>, %arg10: memref<8x16xf32, #tpu.memory_space<vmem>>, %arg11: memref<8x1xf32, #tpu.memory_space<vmem>>, %arg12: memref<8x1xf32, #tpu.memory_space<vmem>>, %arg13: memref<1x1xf32, #tpu.memory_space<vmem>>, %arg14: memref<1x8xf32, #tpu.memory_space<vmem>>) attributes {dimension_semantics = [#tpu.dimension_semantics<parallel>], iteration_bounds = array<i64: 1>, scalar_prefetch = 0 : i64, scratch_operands = 0 : i64, tpu.core_type = #tpu.core_type<tc>, window_params = [{transform_indices = @transform_0, window_bounds = array<i64: 1, 8>}, {transform_indices = @transform_1, window_bounds = array<i64: 1, 8>}, {pipeline_mode = #tpu.pipeline_mode<synchronous>, transform_indices = @transform_2, window_bounds = array<i64: 8, 32>}, {pipeline_mode = #tpu.pipeline_mode<synchronous>, transform_indices = @transform_3, window_bounds = array<i64: 8, 48>}, {pipeline_mode = #tpu.pipeline_mode<synchronous>, transform_indices = @transform_4, window_bounds = array<i64: 32, 8>}, {pipeline_mode = #tpu.pipeline_mode<synchronous>, transform_indices = @transform_5, window_bounds = array<i64: 32, 8>}, {pipeline_mode = #tpu.pipeline_mode<synchronous>, transform_indices = @transform_6, window_bounds = array<i64: 32, 1>}, {pipeline_mode = #tpu.pipeline_mode<synchronous>, transform_indices = @transform_7, window_bounds = array<i64: 16, 32>}, {pipeline_mode = #tpu.pipeline_mode<synchronous>, transform_indices = @transform_8, window_bounds = array<i64: 16, 1>}, {pipeline_mode = #tpu.pipeline_mode<synchronous>, transform_indices = @transform_9, window_bounds = array<i64: 8, 16>}, {pipeline_mode = #tpu.pipeline_mode<synchronous>, transform_indices = @transform_10, window_bounds = array<i64: 8, 1>}, {pipeline_mode = #tpu.pipeline_mode<synchronous>, transform_indices = @transform_11, window_bounds = array<i64: 8, 1>}, {pipeline_mode = #tpu.pipeline_mode<synchronous>, transform_indices = @transform_12, window_bounds = array<i64: 1, 1>}, {transform_indices = @transform_13, window_bounds = array<i64: 1, 8>}]} {
    %c0 = arith.constant 0 : index
    %c0_0 = arith.constant 0 : index
    %0 = vector.load %arg1[%c0, %c0_0] : memref<1x8xi32, #tpu.memory_space<vmem>>, vector<1x8xi32>
    %c0_1 = arith.constant 0 : index
    %c0_2 = arith.constant 0 : index
    %1 = vector.load %arg2[%c0_1, %c0_2] : memref<1x8xi32, #tpu.memory_space<vmem>>, vector<1x8xi32>
    %2 = tpu.iota {dimensions = array<i32: 0>} : vector<32x8xi32>
    %3 = vector.broadcast %0 : vector<1x8xi32> to vector<32x8xi32>
    %4 = arith.cmpi eq, %2, %3 : vector<32x8xi32>
    %5 = arith.extui %4 : vector<32x8xi1> to vector<32x8xi32>
    %6 = arith.sitofp %5 : vector<32x8xi32> to vector<32x8xf32>
    %7 = tpu.iota {dimensions = array<i32: 0>} : vector<48x8xi32>
    %8 = vector.broadcast %1 : vector<1x8xi32> to vector<48x8xi32>
    %9 = arith.cmpi eq, %7, %8 : vector<48x8xi32>
    %10 = arith.extui %9 : vector<48x8xi1> to vector<48x8xi32>
    %11 = arith.sitofp %10 : vector<48x8xi32> to vector<48x8xf32>
    %c0_3 = arith.constant 0 : index
    %c0_4 = arith.constant 0 : index
    %12 = vector.load %arg3[%c0_3, %c0_4] : memref<8x32xf32, #tpu.memory_space<vmem>>, vector<8x32xf32>
    %cst = arith.constant dense<0.000000e+00> : vector<8x8xf32>
    %13 = tpu.matmul %12, %6, %cst {dimension_numbers = #tpu.dot_dimension_numbers<[1], [0], [0], [1], [0, 0, 1, 1], [], []>} : vector<8x32xf32>, vector<32x8xf32>, vector<8x8xf32> -> vector<8x8xf32>
    %c0_5 = arith.constant 0 : index
    %c0_6 = arith.constant 0 : index
    %14 = vector.load %arg4[%c0_5, %c0_6] : memref<8x48xf32, #tpu.memory_space<vmem>>, vector<8x48xf32>
    %cst_7 = arith.constant dense<0.000000e+00> : vector<8x8xf32>
    %15 = tpu.matmul %14, %11, %cst_7 {dimension_numbers = #tpu.dot_dimension_numbers<[1], [0], [0], [1], [0, 0, 1, 1], [], []>} : vector<8x48xf32>, vector<48x8xf32>, vector<8x8xf32> -> vector<8x8xf32>
    %c0_8 = arith.constant 0 : index
    %c0_9 = arith.constant 0 : index
    %16 = vector.load %arg5[%c0_8, %c0_9] : memref<32x8xf32, #tpu.memory_space<vmem>>, vector<32x8xf32>
    %c0_10 = arith.constant 0 : index
    %c0_11 = arith.constant 0 : index
    %17 = vector.load %arg6[%c0_10, %c0_11] : memref<32x8xf32, #tpu.memory_space<vmem>>, vector<32x8xf32>
    %c0_12 = arith.constant 0 : index
    %c0_13 = arith.constant 0 : index
    %18 = vector.load %arg7[%c0_12, %c0_13] : memref<32x1xf32, #tpu.memory_space<vmem>>, vector<32x1xf32>
    %cst_14 = arith.constant dense<0.000000e+00> : vector<32x8xf32>
    %19 = tpu.matmul %16, %13, %cst_14 {dimension_numbers = #tpu.dot_dimension_numbers<[1], [0], [0], [1], [0, 0, 1, 1], [], []>} : vector<32x8xf32>, vector<8x8xf32>, vector<32x8xf32> -> vector<32x8xf32>
    %cst_15 = arith.constant dense<0.000000e+00> : vector<32x8xf32>
    %20 = tpu.matmul %17, %15, %cst_15 {dimension_numbers = #tpu.dot_dimension_numbers<[1], [0], [0], [1], [0, 0, 1, 1], [], []>} : vector<32x8xf32>, vector<8x8xf32>, vector<32x8xf32> -> vector<32x8xf32>
    %21 = arith.addf %19, %20 : vector<32x8xf32>
    %22 = vector.broadcast %18 : vector<32x1xf32> to vector<32x8xf32>
    %23 = arith.addf %21, %22 : vector<32x8xf32>
    %cst_16 = arith.constant 0.000000e+00 : f32
    %24 = vector.broadcast %cst_16 : f32 to vector<32x8xf32>
    %25 = arith.maximumf %23, %24 : vector<32x8xf32>
    %c0_17 = arith.constant 0 : index
    %c0_18 = arith.constant 0 : index
    %26 = vector.load %arg8[%c0_17, %c0_18] : memref<16x32xf32, #tpu.memory_space<vmem>>, vector<16x32xf32>
    %c0_19 = arith.constant 0 : index
    %c0_20 = arith.constant 0 : index
    %27 = vector.load %arg9[%c0_19, %c0_20] : memref<16x1xf32, #tpu.memory_space<vmem>>, vector<16x1xf32>
    %cst_21 = arith.constant dense<0.000000e+00> : vector<16x8xf32>
    %28 = tpu.matmul %26, %25, %cst_21 {dimension_numbers = #tpu.dot_dimension_numbers<[1], [0], [0], [1], [0, 0, 1, 1], [], []>} : vector<16x32xf32>, vector<32x8xf32>, vector<16x8xf32> -> vector<16x8xf32>
    %29 = vector.broadcast %27 : vector<16x1xf32> to vector<16x8xf32>
    %30 = arith.addf %28, %29 : vector<16x8xf32>
    %cst_22 = arith.constant 0.000000e+00 : f32
    %31 = vector.broadcast %cst_22 : f32 to vector<16x8xf32>
    %32 = arith.maximumf %30, %31 : vector<16x8xf32>
    %c0_23 = arith.constant 0 : index
    %c0_24 = arith.constant 0 : index
    %33 = vector.load %arg10[%c0_23, %c0_24] : memref<8x16xf32, #tpu.memory_space<vmem>>, vector<8x16xf32>
    %c0_25 = arith.constant 0 : index
    %c0_26 = arith.constant 0 : index
    %34 = vector.load %arg11[%c0_25, %c0_26] : memref<8x1xf32, #tpu.memory_space<vmem>>, vector<8x1xf32>
    %cst_27 = arith.constant dense<0.000000e+00> : vector<8x8xf32>
    %35 = tpu.matmul %33, %32, %cst_27 {dimension_numbers = #tpu.dot_dimension_numbers<[1], [0], [0], [1], [0, 0, 1, 1], [], []>} : vector<8x16xf32>, vector<16x8xf32>, vector<8x8xf32> -> vector<8x8xf32>
    %36 = vector.broadcast %34 : vector<8x1xf32> to vector<8x8xf32>
    %37 = arith.addf %35, %36 : vector<8x8xf32>
    %cst_28 = arith.constant 0.000000e+00 : f32
    %38 = vector.broadcast %cst_28 : f32 to vector<8x8xf32>
    %39 = arith.maximumf %37, %38 : vector<8x8xf32>
    %c0_29 = arith.constant 0 : index
    %c0_30 = arith.constant 0 : index
    %40 = vector.load %arg12[%c0_29, %c0_30] : memref<8x1xf32, #tpu.memory_space<vmem>>, vector<8x1xf32>
    %c0_31 = arith.constant 0 : index
    %c0_32 = arith.constant 0 : index
    %41 = vector.load %arg13[%c0_31, %c0_32] : memref<1x1xf32, #tpu.memory_space<vmem>>, vector<1x1xf32>
    %42 = vector.broadcast %40 : vector<8x1xf32> to vector<8x8xf32>
    %43 = arith.mulf %42, %39 : vector<8x8xf32>
    %cst_33 = arith.constant dense<0.000000e+00> : vector<8xf32>
    %44 = vector.multi_reduction <add>, %43, %cst_33 [0] : vector<8x8xf32> to vector<8xf32>
    %45 = vector.shape_cast %44 : vector<8xf32> to vector<1x8xf32>
    %46 = vector.broadcast %41 : vector<1x1xf32> to vector<1x8xf32>
    %47 = arith.addf %45, %46 : vector<1x8xf32>
    %48 = arith.negf %47 : vector<1x8xf32>
    %49 = math.exp %48 : vector<1x8xf32>
    %cst_34 = arith.constant 1.000000e+00 : f32
    %50 = vector.broadcast %cst_34 : f32 to vector<1x8xf32>
    %51 = arith.addf %50, %49 : vector<1x8xf32>
    %52 = arith.divf %50, %51 : vector<1x8xf32>
    %c0_35 = arith.constant 0 : index
    %c0_36 = arith.constant 0 : index
    %53 = vector.load %arg14[%c0_35, %c0_36] : memref<1x8xf32, #tpu.memory_space<vmem>>, vector<1x8xf32>
    tpu.vector_store %arg14[%c0_35, %c0_36], %52 {strides = array<i32>} : memref<1x8xf32, #tpu.memory_space<vmem>>, vector<1x8xf32>,
    return
  }
  func.func @transform_0(%arg0: i32) -> (i32, i32) {
    %c0_i32 = arith.constant 0 : i32
    %c0_i32_0 = arith.constant 0 : i32
    return %c0_i32, %arg0 : i32, i32
  }
  func.func @transform_1(%arg0: i32) -> (i32, i32) {
    %c0_i32 = arith.constant 0 : i32
    %c0_i32_0 = arith.constant 0 : i32
    return %c0_i32, %arg0 : i32, i32
  }
  func.func @transform_2(%arg0: i32) -> (i32, i32) {
    %c0_i32 = arith.constant 0 : i32
    %c0_i32_0 = arith.constant 0 : i32
    %c0_i32_1 = arith.constant 0 : i32
    return %c0_i32, %c0_i32_0 : i32, i32
  }
  func.func @transform_3(%arg0: i32) -> (i32, i32) {
    %c0_i32 = arith.constant 0 : i32
    %c0_i32_0 = arith.constant 0 : i32
    %c0_i32_1 = arith.constant 0 : i32
    return %c0_i32, %c0_i32_0 : i32, i32
  }
  func.func @transform_4(%arg0: i32) -> (i32, i32) {
    %c0_i32 = arith.constant 0 : i32
    %c0_i32_0 = arith.constant 0 : i32
    %c0_i32_1 = arith.constant 0 : i32
    return %c0_i32, %c0_i32_0 : i32, i32
  }
  func.func @transform_5(%arg0: i32) -> (i32, i32) {
    %c0_i32 = arith.constant 0 : i32
    %c0_i32_0 = arith.constant 0 : i32
    %c0_i32_1 = arith.constant 0 : i32
    return %c0_i32, %c0_i32_0 : i32, i32
  }
  func.func @transform_6(%arg0: i32) -> (i32, i32) {
    %c0_i32 = arith.constant 0 : i32
    %c0_i32_0 = arith.constant 0 : i32
    %c0_i32_1 = arith.constant 0 : i32
    return %c0_i32, %c0_i32_0 : i32, i32
  }
  func.func @transform_7(%arg0: i32) -> (i32, i32) {
    %c0_i32 = arith.constant 0 : i32
    %c0_i32_0 = arith.constant 0 : i32
    %c0_i32_1 = arith.constant 0 : i32
    return %c0_i32, %c0_i32_0 : i32, i32
  }
  func.func @transform_8(%arg0: i32) -> (i32, i32) {
    %c0_i32 = arith.constant 0 : i32
    %c0_i32_0 = arith.constant 0 : i32
    %c0_i32_1 = arith.constant 0 : i32
    return %c0_i32, %c0_i32_0 : i32, i32
  }
  func.func @transform_9(%arg0: i32) -> (i32, i32) {
    %c0_i32 = arith.constant 0 : i32
    %c0_i32_0 = arith.constant 0 : i32
    %c0_i32_1 = arith.constant 0 : i32
    return %c0_i32, %c0_i32_0 : i32, i32
  }
  func.func @transform_10(%arg0: i32) -> (i32, i32) {
    %c0_i32 = arith.constant 0 : i32
    %c0_i32_0 = arith.constant 0 : i32
    %c0_i32_1 = arith.constant 0 : i32
    return %c0_i32, %c0_i32_0 : i32, i32
  }
  func.func @transform_11(%arg0: i32) -> (i32, i32) {
    %c0_i32 = arith.constant 0 : i32
    %c0_i32_0 = arith.constant 0 : i32
    %c0_i32_1 = arith.constant 0 : i32
    return %c0_i32, %c0_i32_0 : i32, i32
  }
  func.func @transform_12(%arg0: i32) -> (i32, i32) {
    %c0_i32 = arith.constant 0 : i32
    %c0_i32_0 = arith.constant 0 : i32
    %c0_i32_1 = arith.constant 0 : i32
    return %c0_i32, %c0_i32_0 : i32, i32
  }
  func.func @transform_13(%arg0: i32) -> (i32, i32) {
    %c0_i32 = arith.constant 0 : i32
    %c0_i32_0 = arith.constant 0 : i32
    return %c0_i32, %arg0 : i32, i32
  }
}

</mosaic_0001>

<bundles_post_ra>
// kernel: tpu_custom_call.1
= control target key start
LH: loop header
LB: loop body
LE: loop exit
PB: predicated region body
PF: predicated region fallthrough
CT: control target
= control target key end

     0   :  { %s1092_s0 = inlined_call_operand.vmem [shape: s32[1,8], index: 0, kind: input, shape index: {}]   ;;  %s1093_s1 = inlined_call_operand.vmem [shape: s32[1,8], index: 1, kind: input, shape index: {}]   ;;  %s1094_s2 = inlined_call_operand.vmem [shape: f32[8,32], index: 2, kind: input, shape index: {}]   ;;  %s1095_s3 = inlined_call_operand.vmem [shape: f32[8,48], index: 3, kind: input, shape index: {}]   ;;  %s1096_s4 = inlined_call_operand.vmem [shape: f32[32,8], index: 4, kind: input, shape index: {}]   ;;  %s1097_s5 = inlined_call_operand.vmem [shape: f32[32,8], index: 5, kind: input, shape index: {}]   ;;  %s1098_s6 = inlined_call_operand.vmem [shape: f32[32,1], index: 6, kind: input, shape index: {}]   ;;  %s1099_s7 = inlined_call_operand.vmem [shape: f32[16,32], index: 7, kind: input, shape index: {}]   ;;  %s1100_s8 = inlined_call_operand.vmem [shape: f32[16,1], index: 8, kind: input, shape index: {}]   ;;  %s1101_s9 = inlined_call_operand.vmem [shape: f32[8,16], index: 9, kind: input, shape index: {}]   ;;  %s1102_s10 = inlined_call_operand.vmem [shape: f32[8,1], index: 10, kind: input, shape index: {}]   ;;  %s1103_s11 = inlined_call_operand.vmem [shape: f32[8,1], index: 11, kind: input, shape index: {}]   ;;  %s1104_s12 = inlined_call_operand.<no memory space> [shape: f32[1,1], index: 12, kind: input, shape index: {}]   ;;  %s1105_s13 = inlined_call_operand.hbm [shape: f32[1,8], index: 13, kind: output, shape index: {}]  }
   0x1   :  { %v18_v0 = vstv %s1104_s12 }
   0x2   :  { %19 = vst [vmem:[#allocation2] sm:$0x1] %v18_v0 }
   0x3   :  { %v49_v1 = vlaneseq  ;;  %v898_v2 = vmov 0.0|0.0   ;;  %v710_v3 = vld [vmem:[%s1093_s1] ss:$0 sm:$0xff]  ;;  %vm899_vm0 = vmmov 0   ;;  %v900_v6 = vmov 0.0  }
   0x4   :  { %838 = vmatprep.subr.bf16.mxu1 %v898_v2  ;;  %832 = vmatprep.subr.bf16.mxu0 %v898_v2  ;;  %v705_v5 = vld [vmem:[%s1092_s0] ss:$0 sm:$0xff] }
   0x5   :  { %v982_v4 = vshrl.u32 %v49_v1, 7  ;;  %795 = vmatprep.mubr.msk.f32.mxu1 %vm899_vm0, %v900_v6  ;;  %780 = vmatprep.mubr.msk.f32.mxu0 %vm899_vm0, %v900_v6 }
   0x6   :  { %20 = vsyncpa [#allocation4], 0  ;;  %v901_v12 = vmov 1.0|1.0   ;;  %v94_v13 = vld [vmem:[%s1094_s2] sm:$0xff]  ;;  %v254_v17 = vld [vmem:[%s1098_s6 + $0x10] sm:$0xff] }
   0x7   :  { %v51_v7 = vadd.s32 8, %v982_v4  ;;  %vm76_vm1 = vcmp.eq.s32.totalorder %v982_v4, %v710_v3  ;;  %v52_v8 = vadd.s32 16, %v982_v4  ;;  %v53_v9 = vadd.s32 24, %v982_v4  ;;  %v169_v14 = vld [vmem:[%s1095_s3] sm:$0xff]  ;;  %v253_v19 = vld [vmem:[%s1098_s6 + $0x8] sm:$0xff]  ;;  %v255_v20 = vld [vmem:[%s1098_s6 + $0x18] sm:$0xff] }
   0x8   :  { %vm58_vm2 = vcmp.eq.s32.totalorder %v982_v4, %v705_v5  ;;  %v70_v10 = vadd.s32 32, %v982_v4  ;;  %v71_v11 = vadd.s32 40, %v982_v4  ;;  %v248_v15 = vld [vmem:[%s1097_s5] sm:$0xff]  ;;  %v902_v18 = vmov 0   ;;  %v482_v22 = vld [vmem:[%s1100_s8 + $0x8] sm:$0xff]  ;;  %v250_v31 = vld [vmem:[%s1097_s5 + $0x10] sm:$0xff] }
   0x9   :  { %vm77_vm3 = vcmp.eq.s32.totalorder %v51_v7, %v710_v3  ;;  %vm78_vm4 = vcmp.eq.s32.totalorder %v52_v8, %v710_v3  ;;  %vm79_vm5 = vcmp.eq.s32.totalorder %v53_v9, %v710_v3  ;;  %vm59_vm6 = vcmp.eq.s32.totalorder %v51_v7, %v705_v5  ;;  %v252_v16 = vld [vmem:[%s1098_s6] sm:$0xff]  ;;  %868 = vset.pattern.permute.xlu0 %v902_v18  ;;  %v249_v29 = vld [vmem:[%s1097_s5 + $0x8] sm:$0xff]  ;;  %v251_v32 = vld [vmem:[%s1097_s5 + $0x18] sm:$0xff] }
   0xa   :  { %vm839_vm7 = vmpackc.low %vm77_vm3, %vm76_vm1  ;;  %vm60_vm9 = vcmp.eq.s32.totalorder %v52_v8, %v705_v5  ;;  %vm61_vm10 = vcmp.eq.s32.totalorder %v53_v9, %v705_v5  ;;  %vm80_vm12 = vcmp.eq.s32.totalorder %v70_v10, %v710_v3  ;;  %vm81_vm13 = vcmp.eq.s32.totalorder %v71_v11, %v710_v3  ;;  %869 = vset.pattern.permute.xlu1 %v902_v18  ;;  %v481_v21 = vld [vmem:[%s1100_s8] sm:$0xff]  ;;  %v245_v34 = vld [vmem:[%s1096_s4 + $0x8] sm:$0xff] }
   0xb   :  { %840 = vmatpush3.bf16.msk.msra.mxu1 %vm839_vm7, %v901_v12  ;;  %vm842_vm8 = vmpackc.low %vm79_vm5, %vm78_vm4  ;;  %vm95_vm1 = vcmask 261120   ;;  %vm256_vm3 = vcmask 64512   ;;  %453 = vperm.xlu0 %868, %v252_v16   ;;  %v577_v23 = vld [vmem:[%s1102_s10] sm:$0xff]  ;;  %v246_v35 = vld [vmem:[%s1096_s4 + $0x10] sm:$0xff]  ;;  %vm583_vm4 = vcmask 130048  }
   0xc   :  { %841 = vmatprep.subr.bf16.mxu1 %v898_v2  ;;  %vm833_vm11 = vmpackc.low %vm59_vm6, %vm58_vm2  ;;  %vm170_vm2 = vcmask 392192   ;;  %463 = vperm.xlu1 %869, %v254_v17   ;;  %v658_v24 = vld [vmem:[%s1103_s11] sm:$0xff]  ;;  %v247_v36 = vld [vmem:[%s1096_s4 + $0x18] sm:$0xff] }
   0xd   :  { %834 = vmatpush3.bf16.msk.msra.mxu0 %vm833_vm11, %v901_v12  ;;  %vm836_vm14 = vmpackc.low %vm61_vm10, %vm60_vm9  ;;  %v659_v25 = vld [vmem:[#allocation2] sm:$0x1]  ;;  %v480_v56 = vld [vmem:[%s1099_s7 + $0x8] sm:$0xff] }
   0xe   :  { %835 = vmatprep.subr.bf16.mxu0 %v898_v2  ;;  %vm845_vm15 = vmpackc.low %vm81_vm13, %vm80_vm12  ;;  %v244_v33 = vld [vmem:[%s1096_s4] sm:$0xff] }
   0xf   :  { %843 = vmatpush3.bf16.msk.msra.mxu1 %vm842_vm8, %v901_v12  ;;  %458 = vperm.xlu0 %868, %v253_v19   ;;  %v479_v37 = vld [vmem:[%s1099_s7] sm:$0xff]  ;;  %s903_s7 = smov [#allocation3]  }
  0x10   :  { %844 = vmatprep.subr.bf16.mxu1 %v898_v2  ;;  %468 = vperm.xlu1 %869, %v255_v20   ;;  %v576_v3 = vld [vmem:[%s1101_s9] sm:$0xff]  ;;  %s697_s9 = sshll.u32 %s903_s7, 4  ;;  %s698_s9 = int_to_ptr.vmem [resolvable:$true] %s697_s9 }
  0x11   :  { %837 = vmatpush3.bf16.msk.msra.mxu0 %vm836_vm14, %v901_v12  ;;  %s874_s23 = scalar_lea.vmem %s698_s9, 16  ;;  %s878_s24 = scalar_lea.vmem %s698_s9, 32 }
  0x12   :  { %p875_p0 = scmp.ne.s32.totalorder %s698_s9, %s874_s23  ;;  %p879_p1 = scmp.lt.s32.totalorder %s698_s9, %s698_s9 }
  0x13   :  { %846 = vmatpush3.bf16.msk.msra.mxu1 %vm845_vm15, %v901_v12  ;;  %485 = vperm.xlu0 %868, %v481_v21   ;;  %p880_p2 = scmp.lt.s32.totalorder %s878_s24, %s874_s23 }
  0x14   :  { %781 = vmatmul.mubr.msk.f32.vlgmr.msra.gmra.mrb[0].mxu0 %vm95_vm1, %v94_v13  ;;  %490 = vperm.xlu1 %869, %v482_v22  }
  0x15   :  { %800 = vmatprep.mubr.msk.f32.mxu0 %vm256_vm3, %v248_v15  ;;  %v680_v15 = vsub.s32 0, %v982_v4  ;;  %p881_p3 = por %p880_p2, %p879_p1 }
  0x16   :  { %796 = vmatmul.mubr.msk.f32.vlgmr.msra.gmra.mrb[0].mxu1 %vm170_vm2, %v169_v14 }
  0x17   :  { %580 = vperm.xlu0 %868, %v577_v23   ;;  %822 = vmatprep.mubr.msk.f32.mxu1 %vm95_vm1, %v479_v37  ;;  %p882_p4 = pnand %p881_p3, %p875_p0 }
  0x18   :  { %662 = vperm.xlu1 %869, %v658_v24  }
  0x1b   :  { %675 = vperm.xlu0 %868, %v659_v25  }
  0x8a   :  { %v454_v38 = vpop.permute.xlu0 %453 }
  0x8b   :  { %v464_v39 = vpop.permute.xlu1 %463 }
  0x8e   :  { %v459_v40 = vpop.permute.xlu0 %458 }
  0x8f   :  { %v469_v46 = vpop.permute.xlu1 %468 }
  0x92   :  { %v486_v59 = vpop.permute.xlu0 %485 }
  0x93   :  { %v491_v57 = vpop.permute.xlu1 %490 }
  0x97   :  { %v663_v9 = vpop.permute.xlu1 %662 }
  0xe7   :  { %v165_v26 = vpop.f32.mrb[0].mxu0 }
  0xe8   :  { %v782_v27 = vpop.f32.mrb[1].mxu0 }
  0xe9   :  { %v240_v28 = vpop.f32.mrb[0].mxu1 }
  0xea   :  { %v797_v30 = vpop.f32.mrb[1].mxu1  ;;  %798 = vmatprep.subr.mxu0 %v240_v28 }
  0xeb   :  { %799 = vmatpush3.msra.mxu0 %v240_v28 }
  0xec   :  { %801 = vmatmul.mubr.msk.f32.vlgmr.msra.gmra.mrb[2].mxu0 %vm256_vm3, %v249_v29  ;;  %806 = vmatprep.subr.mxu0 %v165_v26 }
  0xed   :  { %807 = vmatpush3.msra.mxu0 %v165_v26  ;;  %803 = vmatprep.mubr.msk.f32.mxu0 %vm256_vm3, %v250_v31 }
  0xf0   :  { %804 = vmatmul.mubr.msk.f32.gmra.mrb[4].mxu0 %vm256_vm3, %v251_v32 }
  0xf1   :  { %808 = vmatprep.mubr.msk.f32.mxu0 %vm256_vm3, %v244_v33 }
  0xf4   :  { %809 = vmatmul.mubr.msk.f32.vlgmr.msra.gmra.mrb[2].mxu0 %vm256_vm3, %v245_v34 }
  0xf5   :  { %811 = vmatprep.mubr.msk.f32.mxu0 %vm256_vm3, %v246_v35 }
  0xf8   :  { %812 = vmatmul.mubr.msk.f32.gmra.mrb[4].mxu0 %vm256_vm3, %v247_v36 }
 0x1c7   :  { %v810_v41 = vpop.f32.mrb[2].mxu0 }
 0x1c8   :  { %v472_v42 = vadd.f32 %v810_v41, %v459_v40  ;;  %v432_v43 = vpop.f32.mrb[3].mxu0 }
 0x1c9   :  { %v471_v44 = vadd.f32 %v454_v38, %v432_v43 }
 0x1ca   :  { %v476_v45 = vmax.f32 %v472_v42, 0.0 }
 0x1cb   :  { %v475_v47 = vmax.f32 %v471_v44, 0.0  ;;  %v813_v48 = vpop.f32.mrb[4].mxu0 }
 0x1cc   :  { %v474_v49 = vadd.f32 %v813_v48, %v469_v46  ;;  %v442_v50 = vpop.f32.mrb[5].mxu0 }
 0x1cd   :  { %v847_v51 = vpack.c.bf16 %v476_v45, %v475_v47  ;;  %v473_v52 = vadd.f32 %v464_v39, %v442_v50 }
 0x1ce   :  { %v478_v53 = vmax.f32 %v474_v49, 0.0 }
 0x1cf   :  { %v477_v54 = vmax.f32 %v473_v52, 0.0  ;;  %848 = vmatprep.subr.bf16.mxu1 %v847_v51 }
 0x1d0   :  { %850 = vmatpush3.bf16.msra.mxu1 %v847_v51 }
 0x1d1   :  { %v851_v55 = vpack.c.bf16 %v478_v53, %v477_v54 }
 0x1d3   :  { %852 = vmatprep.subr.bf16.mxu1 %v851_v55 }
 0x1d4   :  { %854 = vmatpush3.bf16.msra.mxu1 %v851_v55 }
 0x1d5   :  { %855 = vmatprep.subr.bf16.mxu1 %v898_v2  ;;  %v581_v2 = vpop.permute.xlu0 %580 }
 0x1d7   :  { %823 = vmatmul.mubr.msk.f32.vlgmr.msra.gmra.mrb[2].mxu1 %vm95_vm1, %v480_v56 }
 0x1d8   :  { %829 = vmatprep.mubr.msk.f32.mxu1 %vm899_vm0, %v900_v6  ;;  %vm689_vm0 = vcmask 57344  }
 0x1d9   :  { %v676_v17 = vpop.permute.xlu0 %675 }
 0x1da   :  { %v681_v19 = vrot.slane %v676_v17, %v680_v15 }
 0x2aa   :  { %v824_v58 = vpop.f32.mrb[2].mxu1 }
 0x2ab   :  { %v571_v60 = vadd.f32 %v824_v58, %v491_v57  ;;  %v565_v61 = vpop.f32.mrb[3].mxu1 }
 0x2ac   :  { %v566_v62 = vadd.f32 %v565_v61, %v486_v59 }
 0x2ad   :  { %v575_v63 = vmax.f32 %v571_v60, 0.0 }
 0x2ae   :  { %v574_v0 = vmax.f32 %v566_v62, 0.0 }
 0x2b0   :  { %v856_v1 = vpack.c.bf16 %v575_v63, %v574_v0 }
 0x2b2   :  { %857 = vmatpush3.bf16.msra.mxu1 %v856_v1 }
 0x2b5   :  { %830 = vmatmul.mubr.msk.f32.vlgmr.msra.gmra.mrb[4].mxu1 %vm583_vm4, %v576_v3 }
 0x388   :  { %v653_v5 = vpop.f32.mrb[4].mxu1 }
 0x389   :  { %v654_v7 = vadd.f32 %v653_v5, %v581_v2  ;;  %v831_v6 = vpop.f32.mrb[5].mxu1 }
 0x38b   :  { %v657_v8 = vmax.f32 %v654_v7, 0.0 }
 0x38d   :  { %v665_v10 = vmul.f32 %v663_v9, %v657_v8 }
 0x38f   :  { %v666_v11 = vsel %vm256_vm3, %v665_v10, 0.0 }
 0x390   :  { %v667_v12 = vrot.slane %v666_v11, 4 }
 0x392   :  { %v668_v13 = vadd.f32 %v667_v12, %v666_v11 }
 0x394   :  { %v669_v14 = vrot.slane %v668_v13, 2 }
 0x396   :  { %v670_v16 = vadd.f32 %v669_v14, %v668_v13 }
 0x398   :  { %v671_v18 = vrot.slane %v670_v16, 1 }
 0x39a   :  { %v672_v20 = vadd.f32 %v671_v18, %v670_v16 }
 0x39c   :  { %v682_v21 = vadd.f32 %v681_v19, %v672_v20 }
 0x39e   :  { %v740_v22 = vmul.f32 -1.442695, %v682_v21 }
 0x3a0   :  { %870 = vpow2.f32 %v740_v22 }
 0x3aa   :  { %v871_v23 = vpop.eup %870 }
 0x3ab   :  { %v686_v24 = vadd.f32 1.0, %v871_v23 }
 0x3ad   :  { %872 = vrcp.f32 %v686_v24 }
 0x3b7   :  { %v873_v25 = vpop.eup %872 }
 0x3b8   :  { %690 = vst.msk [vmem:[#allocation3] sm:$0x1] %vm689_vm0, %v873_v25 }
 0x3b9   :  { %885 = shalt.err (!%p882_p4)
}
 0x3ba   :  { %s886_s27 = scalar_lea.hbm %s1105_s13, 16 }
 0x3bb   :  { %p887_p5 = scmp.ne.s32.totalorder %s1105_s13, %s886_s27  ;;  %p890_p6 = scmp.lt.u32.totalorder %s886_s27, %s1105_s13 }
 0x3bd   :  { %p892_p7 = pnand %p890_p6, %p887_p5 }
 0x3bf   :  { %895 = shalt.err (!%p892_p7)
}
 0x3c0   :  { %700 = dma.vmem_to_hbm [thread:$0]  %s698_s9, 16, %s1105_s13, [#allocation4]  }
 0x3c1   :  { %896 = dma.done.wait [#allocation4], 16  }
 0x3c2   :  { %897 = vsyncadd [#allocation4], 4294967280 }
 0x3c3   :  { %704 = vsyncpa [#allocation4], 1 }

</bundles_post_ra>
